<compile_context>
chip_gen: v5e
topology: v5e:2x2
jax: 0.10.0
libtpu: 0.0.40
codegen_flags: <defaults>
</compile_context>

<pallas_src>
import jax
import jax.numpy as jnp
from jax.experimental import pallas as pl
from jax.experimental.pallas import tpu as pltpu

C_IN = 256
C_MID = 128
C_OUT = 2
LANE_PAD = 128          # pad the 2-wide Linear output to a full lane register
BN_EPS = 1e-5
MIB = 1024 * 1024


# --------------------------------------------------------------------------- kernels
def _conv_kernel(x_ref, w1_ref, b1_ref, h_ref):
    # Conv1d with kernel_size == seq_len == one (tile_b, S*C) @ (S*C, 128) MXU matmul.
    # bf16 operands, f32 accumulation, f32 bias add.
    h_ref[...] = jnp.dot(x_ref[...], w1_ref[...],
                         preferred_element_type=jnp.float32) + b1_ref[...]


def _bn_linear_tanh_kernel(h_ref, mean_ref, istd_ref, w2_ref, b2_ref, o_ref):
    # BN normalize in f32 (gamma/beta already folded into w2/b2), then bf16 MXU matmul
    # (f32 accum), f32 bias, tanh (EUP), lane-dense (tile_b, 128) store.
    h_hat = (h_ref[...] - mean_ref[...]) * istd_ref[...]
    out = jnp.dot(h_hat.astype(jnp.bfloat16), w2_ref[...],
                  preferred_element_type=jnp.float32) + b2_ref[...]
    o_ref[...] = jnp.tanh(out)


# ------------------------------------------------------------------------ parameters
def init_params(seq_len: int, key):
    """Deterministic synthetic parameters matching the torch module's shapes."""
    k1, k2, k3, k4, k5, k6 = jax.random.split(key, 6)
    conv_w = 0.02 * jax.random.normal(k1, (C_MID, C_IN, seq_len), jnp.float32)
    conv_b = 0.01 * jax.random.normal(k2, (C_MID,), jnp.float32)
    # Non-trivial BN affine so the gamma/beta folding path is actually exercised.
    bn_gamma = 1.0 + 0.1 * jax.random.normal(k5, (C_MID,), jnp.float32)
    bn_beta = 0.05 * jax.random.normal(k6, (C_MID,), jnp.float32)
    lin_w = 0.05 * jax.random.normal(k3, (C_OUT, C_MID), jnp.float32)
    lin_b = 0.01 * jax.random.normal(k4, (C_OUT,), jnp.float32)
    return dict(conv_w=conv_w, conv_b=conv_b,
                bn_gamma=bn_gamma, bn_beta=bn_beta,
                lin_w=lin_w, lin_b=lin_b)


def prepare_params(params):
    """One-time weight preprocessing (hoisted out of the forward pass)."""
    conv_w = params["conv_w"]                               # (128, 256, S)
    _, _, seq_len = conv_w.shape
    # (O, C, K) -> (O, K, C) -> (O, S*C) -> (S*C, O); matches x flattened row-major over (t, c).
    w1 = jnp.transpose(conv_w, (0, 2, 1)).reshape(C_MID, seq_len * C_IN).T
    w1 = w1.astype(jnp.bfloat16)                            # bf16 MXU operand, f32 accum in-kernel
    b1 = params["conv_b"].reshape(1, C_MID).astype(jnp.float32)

    # Fold the BN affine (gamma, beta) into the Linear layer:
    #   out = ((h - mean) * inv_std) @ (gamma[:,None] * lin_w.T) + (lin_b + beta @ lin_w.T)
    gamma, beta = params["bn_gamma"], params["bn_beta"]
    lin_w, lin_b = params["lin_w"], params["lin_b"]
    w2_fold = gamma[:, None] * lin_w.T                      # (128, 2)
    b2_fold = lin_b + beta @ lin_w.T                        # (2,)

    # Pad to 128 output lanes (zero columns) for a lane-dense MXU op + unmasked stores.
    w2p = jnp.zeros((C_MID, LANE_PAD), jnp.float32).at[:, :C_OUT].set(w2_fold)
    b2p = jnp.zeros((1, LANE_PAD), jnp.float32).at[:, :C_OUT].set(b2_fold)
    return dict(w1=w1, b1=b1,
                w2p=w2p.astype(jnp.bfloat16),               # bf16 MXU operand (review item)
                b2p=b2p,                                    # bias stays f32
                seq_len=seq_len)


# ----------------------------------------------------------------------- tile planning
def _vmem_capacity_bytes():
    try:
        return int(pltpu.get_tpu_info().vmem_capacity_bytes)
    except Exception:
        return 128 * MIB           # conservative fallback (v5e/v6e value)


def _plan(batch, sc, tile_b=None):
    cap = _vmem_capacity_bytes()
    cap_req = (3 * cap) // 4                       # leave headroom for Mosaic internal scratch
    w1_bytes = 2 * sc * C_MID * 2                  # bf16 w1, double-buffered (grid-invariant)

    if tile_b is None:
        # Generation-aware per-buffer x-tile budget: big tiles on 128 MiB parts (v5e/v6e),
        # ~10 MiB on 64 MiB-per-TC v7x.  No artificial 512-row cap.
        gen_budget = 28 * MIB if cap >= 100 * MIB else 10 * MIB
        avail = max(2 * MIB, cap_req - w1_bytes - 8 * MIB)
        x_budget = min(gen_budget, avail // 2)
        need = ((batch + 7) // 8) * 8
        tile_b = max(8, min(need, (x_budget // (sc * 2)) // 8 * 8))
    tile_b = max(8, (tile_b // 8) * 8)

    nb = pl.cdiv(batch, tile_b)
    b_pad = nb * tile_b

    est_a = (2 * tile_b * sc * 2          # x tiles (bf16, double-buffered)
             + w1_bytes                   # w1 (bf16, double-buffered)
             + 2 * tile_b * C_MID * 4     # h output tiles (f32, double-buffered)
             + 4 * C_MID * 4 + 64 * 1024)
    vmem_a = int(min(cap_req, max(32 * MIB, est_a + 2 * MIB)))

    est_b = (2 * tile_b * C_MID * 4       # h tiles in
             + 2 * tile_b * LANE_PAD * 4  # out tiles
             + 2 * C_MID * LANE_PAD * 2   # w2 (bf16)
             + 8 * LANE_PAD * 4 + 64 * 1024)
    vmem_b = int(min(cap_req, max(16 * MIB, est_b + 2 * MIB)))
    return tile_b, nb, b_pad, vmem_a, vmem_b


# --------------------------------------------------------------------------- wrapper
def simple_cnn_forward(x, prep, tile_b=None):
    """x: (B, seq_len, 256) float32  ->  (B, 2) float32 (torch train-mode BN semantics)."""
    B, S, C = x.shape
    assert C == C_IN and S == prep["seq_len"]
    SC = S * C
    tile_b, nb, b_pad, vmem_a, vmem_b = _plan(B, SC, tile_b)

    x_flat = x.reshape(B, SC).astype(jnp.bfloat16)
    if b_pad != B:
        x_flat = jnp.pad(x_flat, ((0, b_pad - B), (0, 0)))

    # ---- stage 1: conv-as-matmul, batch-parallel grid (no B-scaling VMEM scratch) ----
    h = pl.pallas_call(
        _conv_kernel,
        out_shape=jax.ShapeDtypeStruct((b_pad, C_MID), jnp.float32),
        grid=(nb,),
        in_specs=[
            pl.BlockSpec((tile_b, SC), lambda i: (i, 0)),          # x: streamed per tile
            pl.BlockSpec((SC, C_MID), lambda i: (0, 0)),           # w1 (grid-invariant)
            pl.BlockSpec((1, C_MID), lambda i: (0, 0)),            # b1
        ],
        out_specs=pl.BlockSpec((tile_b, C_MID), lambda i: (i, 0)),
        compiler_params=pltpu.CompilerParams(
            dimension_semantics=("parallel",),                     # megacore-splittable
            vmem_limit_bytes=vmem_a,
        ),
    )(x_flat, prep["w1"], prep["b1"])

    # ---- stage 2: train-mode BN batch statistics (biased var) on (B, 128) — tiny XLA ----
    hv = h[:B]                                  # padded rows never enter the statistics
    mean = jnp.mean(hv, axis=0, keepdims=True)
    var = jnp.mean(jnp.square(hv - mean), axis=0, keepdims=True)
    inv_std = jax.lax.rsqrt(var + BN_EPS)

    # ---- stage 3: normalize + folded Linear + tanh, batch-parallel grid ----
    out_pad = pl.pallas_call(
        _bn_linear_tanh_kernel,
        out_shape=jax.ShapeDtypeStruct((b_pad, LANE_PAD), jnp.float32),
        grid=(nb,),
        in_specs=[
            pl.BlockSpec((tile_b, C_MID), lambda i: (i, 0)),       # h
            pl.BlockSpec((1, C_MID), lambda i: (0, 0)),            # mean
            pl.BlockSpec((1, C_MID), lambda i: (0, 0)),            # inv_std
            pl.BlockSpec((C_MID, LANE_PAD), lambda i: (0, 0)),     # w2 (folded, padded, bf16)
            pl.BlockSpec((1, LANE_PAD), lambda i: (0, 0)),         # b2 (folded, padded, f32)
        ],
        out_specs=pl.BlockSpec((tile_b, LANE_PAD), lambda i: (i, 0)),
        compiler_params=pltpu.CompilerParams(
            dimension_semantics=("parallel",),
            vmem_limit_bytes=vmem_b,
        ),
    )(h, mean, inv_std, prep["w2p"], prep["b2p"])

    return out_pad[:B, :C_OUT]


# ------------------------------------------------------------------------- reference
def simple_cnn_reference(x, params, conv_dtype=jnp.float32):
    """Pure-JAX reference (torch train-mode BN). conv_dtype=bfloat16 mirrors the kernel's MXU path."""
    B, S, C = x.shape
    x_flat = x.reshape(B, S * C)
    w1 = jnp.transpose(params["conv_w"], (0, 2, 1)).reshape(C_MID, S * C)
    h = jnp.dot(x_flat.astype(conv_dtype), w1.T.astype(conv_dtype),
                preferred_element_type=jnp.float32) + params["conv_b"]
    mean = jnp.mean(h, axis=0, keepdims=True)
    var = jnp.mean((h - mean) ** 2, axis=0, keepdims=True)
    h = (h - mean) / jnp.sqrt(var + BN_EPS)
    h = h * params["bn_gamma"] + params["bn_beta"]
    out = h @ params["lin_w"].T + params["lin_b"]
    return jnp.tanh(out)


if __name__ == "__main__":
    seq_len = 8
    batch = 44          # deliberately not a tile multiple -> exercises padding + stat slicing

    key = jax.random.PRNGKey(0)
    kx, kp = jax.random.split(key)
    x = jax.random.normal(kx, (batch, seq_len, C_IN), jnp.float32)
    params = init_params(seq_len, kp)
    prep = prepare_params(params)                 # one-time weight preprocessing

    ref_bf16 = simple_cnn_reference(x, params, conv_dtype=jnp.bfloat16)  # bf16-conv matched
    ref_f32 = simple_cnn_reference(x, params, conv_dtype=jnp.float32)    # torch-semantics sanity

    # tile_b=16 -> 3 batch tiles (multi-tile grids); tile_b=None -> auto-planned single tile.
    for tb in (16, None):
        out = jax.block_until_ready(simple_cnn_forward(x, prep, tile_b=tb))
        assert out.shape == (batch, C_OUT)
        # bf16 second-matmul operands add a few e-3 of error vs the bf16-conv/f32-linear ref.
        assert jnp.allclose(out, ref_bf16, atol=1e-2, rtol=1e-2), "mismatch vs bf16-conv reference"
        assert jnp.allclose(out, ref_f32, atol=5e-2, rtol=5e-2), "mismatch vs f32 reference"

    print("KERNEL_OK")
</pallas_src>

<mosaic_0001>
module attributes {stable_mosaic.version = 11 : i64} {
  func.func @_conv_kernel(%arg0: i32, %arg1: memref<16x2048xbf16, #tpu.memory_space<vmem>>, %arg2: memref<2048x128xbf16, #tpu.memory_space<vmem>>, %arg3: memref<1x128xf32, #tpu.memory_space<vmem>>, %arg4: memref<16x128xf32, #tpu.memory_space<vmem>>) attributes {dimension_semantics = [#tpu.dimension_semantics<parallel>], iteration_bounds = array<i64: 3>, scalar_prefetch = 0 : i64, scratch_operands = 0 : i64, tpu.core_type = #tpu.core_type<tc>, window_params = [{transform_indices = @transform_0, window_bounds = array<i64: 16, 2048>}, {pipeline_mode = #tpu.pipeline_mode<synchronous>, transform_indices = @transform_1, window_bounds = array<i64: 2048, 128>}, {pipeline_mode = #tpu.pipeline_mode<synchronous>, transform_indices = @transform_2, window_bounds = array<i64: 1, 128>}, {transform_indices = @transform_3, window_bounds = array<i64: 16, 128>}]} {
    %c0 = arith.constant 0 : index
    %c0_0 = arith.constant 0 : index
    %0 = vector.load %arg1[%c0, %c0_0] : memref<16x2048xbf16, #tpu.memory_space<vmem>>, vector<16x2048xbf16>
    %c0_1 = arith.constant 0 : index
    %c0_2 = arith.constant 0 : index
    %1 = vector.load %arg2[%c0_1, %c0_2] : memref<2048x128xbf16, #tpu.memory_space<vmem>>, vector<2048x128xbf16>
    %cst = arith.constant dense<0.000000e+00> : vector<16x128xf32>
    %2 = tpu.matmul %0, %1, %cst {dimension_numbers = #tpu.dot_dimension_numbers<[1], [0], [0], [1], [0, 0, 1, 1], [], []>} : vector<16x2048xbf16>, vector<2048x128xbf16>, vector<16x128xf32> -> vector<16x128xf32>
    %c0_3 = arith.constant 0 : index
    %c0_4 = arith.constant 0 : index
    %3 = vector.load %arg3[%c0_3, %c0_4] : memref<1x128xf32, #tpu.memory_space<vmem>>, vector<1x128xf32>
    %4 = vector.broadcast %3 : vector<1x128xf32> to vector<16x128xf32>
    %5 = arith.addf %2, %4 : vector<16x128xf32>
    %c0_5 = arith.constant 0 : index
    %c0_6 = arith.constant 0 : index
    %6 = vector.load %arg4[%c0_5, %c0_6] : memref<16x128xf32, #tpu.memory_space<vmem>>, vector<16x128xf32>
    tpu.vector_store %arg4[%c0_5, %c0_6], %5 {strides = array<i32>} : memref<16x128xf32, #tpu.memory_space<vmem>>, vector<16x128xf32>,
    return
  }
  func.func @transform_0(%arg0: i32) -> (i32, i32) {
    %c0_i32 = arith.constant 0 : i32
    %c0_i32_0 = arith.constant 0 : i32
    return %arg0, %c0_i32 : i32, i32
  }
  func.func @transform_1(%arg0: i32) -> (i32, i32) {
    %c0_i32 = arith.constant 0 : i32
    %c0_i32_0 = arith.constant 0 : i32
    %c0_i32_1 = arith.constant 0 : i32
    return %c0_i32, %c0_i32_0 : i32, i32
  }
  func.func @transform_2(%arg0: i32) -> (i32, i32) {
    %c0_i32 = arith.constant 0 : i32
    %c0_i32_0 = arith.constant 0 : i32
    %c0_i32_1 = arith.constant 0 : i32
    return %c0_i32, %c0_i32_0 : i32, i32
  }
  func.func @transform_3(%arg0: i32) -> (i32, i32) {
    %c0_i32 = arith.constant 0 : i32
    %c0_i32_0 = arith.constant 0 : i32
    return %arg0, %c0_i32 : i32, i32
  }
}

</mosaic_0001>

<bundles_post_ra>
// kernel: tpu_custom_call.1
= control target key start
LH: loop header
LB: loop body
LE: loop exit
PB: predicated region body
PF: predicated region fallthrough
CT: control target
= control target key end

     0   :  { %8 = vsyncpa [#allocation3], 0  ;;  %s2800_s0 = inlined_call_operand.hbm [shape: bf16[48,2048], index: 0, kind: input, shape index: {}]   ;;  %s2801_s1 = inlined_call_operand.hbm [shape: bf16[2048,128], index: 1, kind: input, shape index: {}]   ;;  %s2802_s2 = inlined_call_operand.vmem [shape: f32[1,128], index: 2, kind: input, shape index: {}]   ;;  %s2803_s3 = inlined_call_operand.hbm [shape: f32[48,128], index: 3, kind: output, shape index: {}]  }
   0x1   :  { %10 = vsyncpa [#allocation3 + $0x1], 0 }
   0x2   :  { %11 = vsyncpa [#allocation6], 0 }
   0x3   :  { %12 = vsyncpa [#allocation4], 0 }
   0x4   :  { %14 = vsyncpa [#allocation4 + $0x1], 0  ;;  %s2621_s12 = smov 0   ;;  %s2623_s13 = smov 0  }
   0x5   :  { %s2625_s14 = smov 0   ;;  %s2627_s15 = smov 0  }
   0x6 LB: > { %s2642_s16 = sadd.s32 4294967295, %s2593_s15   ;;  %s1660_s17 = sadd.s32 4294967294, %s2593_s15   ;;  %s2593_s15 = sphi %s2627_s15, %s2812_s15   ;;  %s2589_s14 = sphi %s2625_s14, %s2811_s14   ;;  %s2585_s13 = sphi %s2623_s13, %s2810_s13   ;;  %s2581_s12 = sphi %s2621_s12, %s2809_s12  }
   0x7   : > { %p40_p0 = scmp.ne.s32.totalorder %s2585_s13, %s2581_s12  ;;  %p41_p1 = scmp.eq.s32.totalorder %s2642_s16, 0 }
   0x8   : > { %p106_p2 = scmp.eq.s32.totalorder %s2642_s16, 2  ;;  %p112_p3 = scmp.eq.s32.totalorder %s1660_s17, 2 }
   0x9   : > { %p2651_p4 = por %p41_p1, %p40_p0  ;;  %p1661_p5 = scmp.ge.s32.totalorder %s2593_s15, 1 }
   0xa   : > { %p2656_p6 = por %p112_p3, %p40_p0  ;;  %p119_p7 = scmp.lt.s32.totalorder %s2593_s15, 4 }
   0xb   : > { %s130_s22 = sshll.u32 %s2801_s1, 4  ;;  %s2595_s24 = smov [#allocation5]   ;;  %s131_s22 = int_to_ptr.hbm [resolvable:$true] %s130_s22 }
   0xc   : > { %p2664_p8 = pnand %p1661_p5, %p119_p7  ;;  %s132_s25 = sshll.u32 %s2595_s24, 4  ;;  %s133_s25 = int_to_ptr.vmem [resolvable:$true] %s132_s25 }
   0xd   : > { %s2673_s26 = sadd.s32 1, %s2593_s15   ;;  %s2596_s27 = smov 64  }
   0xe   : > { %p2408_p9 = pneg %p2664_p8  ;;  %s2597_s28 = smov 4  }
   0xf   : > { %s24_s29 = ssub.s32 %s2593_s15, %s2673_s26  ;;  %s27_s30 = sadd.s32 1, %s2589_s14 }
  0x10   : > { %p2409_p10 = pnand %p2408_p9, %p41_p1  ;;  %p25_p11 = scmp.eq.s32.totalorder %s24_s29, 0 }
  0x11   : > { %p34_p12 = scmp.ne.s32.totalorder %s2589_s14, %s2585_s13  ;;  %p35_p13 = scmp.eq.s32.totalorder %s2593_s15, 0 }
  0x12   : > { %2411 = dma.hbm_to_vmem [thread:$0]  (!%p2409_p10), %s131_s22, 16384, %s133_s25, [#allocation6], %s2596_s27, %s2596_s27, %s2597_s28  }
  0x13   : > { %p2421_p0 = scmp.lt.s32.totalorder %s2593_s15, 3  ;;  %p36_p3 = por %p35_p13, %p34_p12 }
  0x14   : > { %s2685_s4 = scalar_select %p25_p11, %s2589_s14, %s27_s30  }
  0x15   : > { %p2689_p5 = por %p106_p2, %p34_p12  ;;  %s149_s6 = sand.u32 1, %s2589_s14  }
  0x16   : > { %s2254_s7 = sshll.u32 %s2593_s15, 7  ;;  %s1664_s8 = sshll.u32 %s149_s6, 7 }
  0x17   : > { %s159_s11 = scalar_lea.hbm %s2800_s0, %s2254_s7  ;;  %s153_s20 = scalar_lea.vmem [#allocation2], %s1664_s8 }
  0x18   : > { %s160_s17 = sshll.u32 %s159_s11, 4  ;;  %s162_s21 = sshll.u32 %s153_s20, 4  ;;  %s161_s17 = int_to_ptr.hbm [resolvable:$true] %s160_s17  ;;  %s163_s21 = int_to_ptr.vmem [resolvable:$true] %s162_s21 }
  0x19   : > { %p2700_p7 = pnand %p2421_p0, %p36_p3  ;;  %s150_s24 = scalar_lea.sflag [#allocation3], %s149_s6 }
  0x1a   : > { %s2493_s25 = sshra.s32 %s161_s17, 4  ;;  %s2500_s7 = scalar_lea.hbm %s2800_s0, 384  ;;  %s2494_s25 = int_to_ptr.hbm [resolvable:$true] %s2493_s25 }
  0x1b   : > { %s2495_s28 = scalar_lea.hbm %s2494_s25, 128  ;;  %p2497_p9 = pneg %p2700_p7 }
  0x1c   : > { %p2496_p2 = scmp.ne.s32.totalorder %s2494_s25, %s2495_s28  ;;  %p2501_p12 = scmp.lt.s32.totalorder %s2494_s25, %s2800_s0 }
  0x1d   : > { %p2502_p13 = scmp.lt.s32.totalorder %s2500_s7, %s2495_s28 }
  0x1e   : > { %p2498_p10 = pnand %p2497_p9, %p2496_p2 }
  0x1f   : > { %p2503_p0 = por %p2502_p13, %p2501_p12 }
  0x20   : > { %p2499_p11 = pneg %p2498_p10 }
  0x22   : > { %p2504_p3 = pnand %p2503_p0, %p2499_p11 }
  0x24   : > { %2507 = shalt.err (!%p2504_p3)
}
  0x25   : > { %s2598_s6 = smov 1024   ;;  %174 = sbr.rel (%p2664_p8) target bundleno = 323 (0x143), region = 32 }
  0x26   : > { %2415 = dma.hbm_to_vmem [thread:$0]  (!%p2700_p7), %s161_s17, 2048, %s163_s21, %s150_s24, %s2598_s6, %s2598_s6, %s2596_s27  }
  0x27   : > { %s2718_s10 = sand.u32 (!%p2664_p8), 1, %s2585_s13  }
  0x28   : > { %s1669_s11 = sshll.u32 (!%p2664_p8), %s2718_s10, 7  ;;  %s177_s20 = scalar_lea.sflag (!%p2664_p8), [#allocation3], %s2718_s10 }
  0x29   : > { %s2722_s25 = scalar_lea.vmem (!%p2664_p8), [#allocation2], %s1669_s11 }
  0x2a   : > { %2568 = dma.done.wait (%p2651_p4), %s177_s20, 2048  }
  0x2b   : > { %2570 = vsyncadd (%p2651_p4), %s177_s20, 4294965248 }
  0x2c   : > { %2572 = dma.done.wait (%p41_p1), [#allocation6], 16384  }
  0x2d   : > { %2574 = vsyncadd (%p41_p1), [#allocation6], 4294950912  ;;  %v2278_v0 = vld [vmem:[#allocation5 + $0x38] sm:$0xff]  ;;  %v2277_v4 = vld [vmem:[#allocation5 + $0x30] sm:$0xff]  ;;  %s1671_s27 = sshll.u32 %s2718_s10, 4  ;;  %s2399_s17 = sshll.u32 %s2642_s16, 4 }
  0x2e   : > { %v2286_v1 = vld [vmem:[#allocation5 + $0x78] sm:$0xff]  ;;  %1335 = vmatpush.bf16.msra.mxu0 %v2278_v0  ;;  %v2285_v5 = vld [vmem:[#allocation5 + $0x70] sm:$0xff]  ;;  %v2276_v8 = vld [vmem:[#allocation5 + $0x28] sm:$0xff]  ;;  %s1573_s24 = scalar_lea.hbm %s2803_s3, %s2399_s17  ;;  %s208_s28 = scalar_lea.vmem [#allocation7], %s1671_s27 }
  0x2f   : > { %v2294_v2 = vld [vmem:[#allocation5 + $0xb8] sm:$0xff]  ;;  %1349 = vmatpush.bf16.msra.mxu1 %v2286_v1  ;;  %v2293_v6 = vld [vmem:[#allocation5 + $0xb0] sm:$0xff]  ;;  %v2284_v9 = vld [vmem:[#allocation5 + $0x68] sm:$0xff]  ;;  %s1574_s29 = sshll.u32 %s208_s28, 4  ;;  %s1576_s30 = sshll.u32 %s1573_s24, 4  ;;  %s1575_s29 = int_to_ptr.vmem [resolvable:$true] %s1574_s29  ;;  %s1577_s30 = int_to_ptr.hbm [resolvable:$true] %s1576_s30 }
  0x30   : > { %v2302_v3 = vld [vmem:[#allocation5 + $0xf8] sm:$0xff]  ;;  %1363 = vmatpush.bf16.msra.mxu2 %v2294_v2  ;;  %v2301_v7 = vld [vmem:[#allocation5 + $0xf0] sm:$0xff]  ;;  %v2292_v10 = vld [vmem:[#allocation5 + $0xa8] sm:$0xff]  ;;  %s1562_s16 = scalar_lea.sflag [#allocation4], %s2718_s10  ;;  %s2537_s7 = sshra.s32 %s1577_s30, 4  ;;  %s2538_s7 = int_to_ptr.hbm [resolvable:$true] %s2537_s7 }
  0x31   : > { %1377 = vmatpush.bf16.msra.mxu3 %v2302_v3  ;;  %v2300_v11 = vld [vmem:[#allocation5 + $0xe8] sm:$0xff]  ;;  %v2275_v12 = vld [vmem:[#allocation5 + $0x20] sm:$0xff]  ;;  %v2274_v16 = vld [vmem:[#allocation5 + $0x18] sm:$0xff]  ;;  %s2539_s8 = scalar_lea.hbm %s2538_s7, 16  ;;  %s2543_s11 = scalar_lea.hbm %s2803_s3, 48 }
  0x32   : > { %1336 = vmatpush.bf16.msra.mxu0 %v2277_v4  ;;  %v2283_v13 = vld [vmem:[#allocation5 + $0x60] sm:$0xff]  ;;  %v2282_v17 = vld [vmem:[#allocation5 + $0x58] sm:$0xff]  ;;  %v2273_v20 = vld [vmem:[#allocation5 + $0x10] sm:$0xff]  ;;  %p2540_p1 = scmp.ne.s32.totalorder %s2538_s7, %s2539_s8  ;;  %p2544_p7 = scmp.lt.s32.totalorder %s2538_s7, %s2803_s3 }
  0x33   : > { %1350 = vmatpush.bf16.msra.mxu1 %v2285_v5  ;;  %v2291_v14 = vld [vmem:[#allocation5 + $0xa0] sm:$0xff]  ;;  %v2290_v18 = vld [vmem:[#allocation5 + $0x98] sm:$0xff]  ;;  %v2281_v21 = vld [vmem:[#allocation5 + $0x50] sm:$0xff]  ;;  %p2545_p2 = scmp.lt.s32.totalorder %s2543_s11, %s2539_s8 }
  0x34   : > { %1364 = vmatpush.bf16.msra.mxu2 %v2293_v6  ;;  %v2299_v15 = vld [vmem:[#allocation5 + $0xe0] sm:$0xff]  ;;  %v2298_v19 = vld [vmem:[#allocation5 + $0xd8] sm:$0xff]  ;;  %v2289_v22 = vld [vmem:[#allocation5 + $0x90] sm:$0xff]  ;;  %p2541_p4 = pnand %p2540_p1, %p2689_p5 }
  0x35   : > { %1378 = vmatpush.bf16.msra.mxu3 %v2301_v7  ;;  %v2297_v23 = vld [vmem:[#allocation5 + $0xd0] sm:$0xff]  ;;  %v2272_v24 = vld [vmem:[#allocation5 + $0x8] sm:$0xff]  ;;  %v2271_v28 = vld [vmem:[#allocation5] sm:$0xff]  ;;  %p2546_p9 = por %p2545_p2, %p2544_p7 }
  0x36   : > { %1337 = vmatpush.bf16.msra.mxu0 %v2276_v8  ;;  %v2280_v25 = vld [vmem:[#allocation5 + $0x48] sm:$0xff]  ;;  %v2279_v29 = vld [vmem:[#allocation5 + $0x40] sm:$0xff]  ;;  %v2310_v32 = vld [vmem:[#allocation5 + $0x138] sm:$0xff]  ;;  %p2542_p8 = pneg %p2541_p4 }
  0x37   : > { %1351 = vmatpush.bf16.msra.mxu1 %v2284_v9  ;;  %v2288_v26 = vld [vmem:[#allocation5 + $0x88] sm:$0xff]  ;;  %v2287_v30 = vld [vmem:[#allocation5 + $0x80] sm:$0xff]  ;;  %v2318_v33 = vld [vmem:[#allocation5 + $0x178] sm:$0xff] }
  0x38   : > { %1365 = vmatpush.bf16.msra.mxu2 %v2292_v10  ;;  %v2296_v27 = vld [vmem:[#allocation5 + $0xc8] sm:$0xff]  ;;  %v2295_v31 = vld [vmem:[#allocation5 + $0xc0] sm:$0xff]  ;;  %v2326_v42 = vld [vmem:[#allocation5 + $0x1b8] sm:$0xff]  ;;  %p2547_p10 = pnand %p2546_p9, %p2542_p8 }
  0x39   : > { %1379 = vmatpush.bf16.msra.mxu3 %v2300_v11  ;;  %v1674_v34 = vld [vmem:[%s2722_s25] sm:$0xf]  ;;  %v1682_v36 = vld [vmem:[%s2722_s25 + $0x8] sm:$0xf]  ;;  %v2255_v38 = vld [vmem:[%s2722_s25 + $0x4] sm:$0xf] }
  0x3a   : > { %1338 = vmatpush.bf16.msra.mxu0 %v2275_v12  ;;  %v2263_v35 = vld [vmem:[%s2722_s25 + $0x3c] sm:$0xf0]  ;;  %v2264_v37 = vld [vmem:[%s2722_s25 + $0x44] sm:$0xf0]  ;;  %v1676_v39 = vld [vmem:[%s2722_s25 + $0x40] sm:$0xf0] }
  0x3b   : > { %1352 = vmatpush.bf16.msra.mxu1 %v2283_v13  ;;  %v2256_v40 = vld [vmem:[%s2722_s25 + $0xc] sm:$0xf]  ;;  %v2334_v43 = vld [vmem:[#allocation5 + $0x1f8] sm:$0xff]  ;;  %v1675_v44 = vor.u32 %v2263_v35, %v1674_v34  ;;  %v1683_v45 = vor.u32 %v2264_v37, %v1682_v36  ;;  %v1679_v46 = vor.u32 %v2255_v38, %v1676_v39  ;;  %v2309_v48 = vld [vmem:[#allocation5 + $0x130] sm:$0xff] }
  0x3c   : > { %1366 = vmatpush.bf16.msra.mxu2 %v2291_v14  ;;  %v1684_v41 = vld [vmem:[%s2722_s25 + $0x48] sm:$0xf0]  ;;  %v2317_v49 = vld [vmem:[#allocation5 + $0x170] sm:$0xff]  ;;  %v2307_v56 = vld [vmem:[#allocation5 + $0x120] sm:$0xff] }
  0x3d   : > { %1380 = vmatpush.bf16.msra.mxu3 %v2299_v15  ;;  %v1687_v47 = vor.u32 %v2256_v40, %v1684_v41  ;;  %v2325_v50 = vld [vmem:[#allocation5 + $0x1b0] sm:$0xff]  ;;  %v2308_v52 = vld [vmem:[#allocation5 + $0x128] sm:$0xff]  ;;  %v2315_v57 = vld [vmem:[#allocation5 + $0x160] sm:$0xff] }
  0x3e   : > { %1339 = vmatpush.bf16.msra.mxu0 %v2274_v16  ;;  %v2333_v51 = vld [vmem:[#allocation5 + $0x1f0] sm:$0xff]  ;;  %v2316_v53 = vld [vmem:[#allocation5 + $0x168] sm:$0xff]  ;;  %v2323_v58 = vld [vmem:[#allocation5 + $0x1a0] sm:$0xff] }
  0x3f   : > { %1353 = vmatpush.bf16.msra.mxu1 %v2282_v17  ;;  %v2324_v54 = vld [vmem:[#allocation5 + $0x1a8] sm:$0xff]  ;;  %v2331_v59 = vld [vmem:[#allocation5 + $0x1e0] sm:$0xff]  ;;  %v2306_v60 = vld [vmem:[#allocation5 + $0x118] sm:$0xff] }
  0x40   : > { %1367 = vmatpush.bf16.msra.mxu2 %v2290_v18  ;;  %v2332_v55 = vld [vmem:[#allocation5 + $0x1e8] sm:$0xff]  ;;  %v2314_v61 = vld [vmem:[#allocation5 + $0x158] sm:$0xff]  ;;  %v2305_v0 = vld [vmem:[#allocation5 + $0x110] sm:$0xff] }
  0x41   : > { %1381 = vmatpush.bf16.msra.mxu3 %v2298_v19  ;;  %v2322_v62 = vld [vmem:[#allocation5 + $0x198] sm:$0xff]  ;;  %v2313_v1 = vld [vmem:[#allocation5 + $0x150] sm:$0xff]  ;;  %v2304_v4 = vld [vmem:[#allocation5 + $0x108] sm:$0xff] }
  0x42   : > { %1340 = vmatpush.bf16.msra.mxu0 %v2273_v20  ;;  %v2330_v63 = vld [vmem:[#allocation5 + $0x1d8] sm:$0xff]  ;;  %v2321_v2 = vld [vmem:[#allocation5 + $0x190] sm:$0xff]  ;;  %v2312_v5 = vld [vmem:[#allocation5 + $0x148] sm:$0xff] }
  0x43   : > { %1354 = vmatpush.bf16.msra.mxu1 %v2281_v21  ;;  %v2329_v3 = vld [vmem:[#allocation5 + $0x1d0] sm:$0xff]  ;;  %v2320_v6 = vld [vmem:[#allocation5 + $0x188] sm:$0xff]  ;;  %v2303_v8 = vld [vmem:[#allocation5 + $0x100] sm:$0xff] }
  0x44   : > { %1368 = vmatpush.bf16.msra.mxu2 %v2289_v22  ;;  %v2328_v7 = vld [vmem:[#allocation5 + $0x1c8] sm:$0xff]  ;;  %v2311_v9 = vld [vmem:[#allocation5 + $0x140] sm:$0xff]  ;;  %v2342_v12 = vld [vmem:[#allocation5 + $0x238] sm:$0xff] }
  0x45   : > { %1382 = vmatpush.bf16.msra.mxu3 %v2297_v23  ;;  %v2319_v10 = vld [vmem:[#allocation5 + $0x180] sm:$0xff]  ;;  %v2350_v13 = vld [vmem:[#allocation5 + $0x278] sm:$0xff]  ;;  %v1690_v14 = vld [vmem:[%s2722_s25 + $0x10] sm:$0xf] }
  0x46   : > { %1341 = vmatpush.bf16.msra.mxu0 %v2272_v24  ;;  %v2327_v11 = vld [vmem:[#allocation5 + $0x1c0] sm:$0xff]  ;;  %v2265_v15 = vld [vmem:[%s2722_s25 + $0x4c] sm:$0xf0]  ;;  %v1698_v16 = vld [vmem:[%s2722_s25 + $0x18] sm:$0xf] }
  0x47   : > { %1355 = vmatpush.bf16.msra.mxu1 %v2280_v25  ;;  %v2266_v17 = vld [vmem:[%s2722_s25 + $0x54] sm:$0xf0]  ;;  %v2257_v18 = vld [vmem:[%s2722_s25 + $0x14] sm:$0xf]  ;;  %v2258_v20 = vld [vmem:[%s2722_s25 + $0x1c] sm:$0xf]  ;;  %v1691_v24 = vor.u32 %v2265_v15, %v1690_v14 }
  0x48   : > { %1369 = vmatpush.bf16.msra.mxu2 %v2288_v26  ;;  %v1692_v19 = vld [vmem:[%s2722_s25 + $0x50] sm:$0xf0]  ;;  %v1700_v21 = vld [vmem:[%s2722_s25 + $0x58] sm:$0xf0]  ;;  %v1699_v25 = vor.u32 %v2266_v17, %v1698_v16  ;;  %v2356_v34 = vld [vmem:[#allocation5 + $0x2a8] sm:$0xff] }
  0x49   : > { %1383 = vmatpush.bf16.msra.mxu3 %v2296_v27  ;;  %v2358_v22 = vld [vmem:[#allocation5 + $0x2b8] sm:$0xff]  ;;  %v1695_v26 = vor.u32 %v2257_v18, %v1692_v19  ;;  %v1703_v27 = vor.u32 %v2258_v20, %v1700_v21  ;;  %v2364_v35 = vld [vmem:[#allocation5 + $0x2e8] sm:$0xff]  ;;  %v2339_v36 = vld [vmem:[#allocation5 + $0x220] sm:$0xff] }
  0x4a   : > { %1342 = vmatpush.bf16.msra.mxu0 %v2271_v28  ;;  %v2366_v23 = vld [vmem:[#allocation5 + $0x2f8] sm:$0xff]  ;;  %v2341_v28 = vld [vmem:[#allocation5 + $0x230] sm:$0xff]  ;;  %v2347_v37 = vld [vmem:[#allocation5 + $0x260] sm:$0xff] }
  0x4b   : > { %1356 = vmatpush.bf16.msra.mxu1 %v2279_v29  ;;  %v2349_v29 = vld [vmem:[#allocation5 + $0x270] sm:$0xff]  ;;  %v2355_v38 = vld [vmem:[#allocation5 + $0x2a0] sm:$0xff]  ;;  %v2338_v40 = vld [vmem:[#allocation5 + $0x218] sm:$0xff] }
  0x4c   : > { %1370 = vmatpush.bf16.msra.mxu2 %v2287_v30  ;;  %v2357_v30 = vld [vmem:[#allocation5 + $0x2b0] sm:$0xff]  ;;  %v2363_v39 = vld [vmem:[#allocation5 + $0x2e0] sm:$0xff]  ;;  %v2346_v41 = vld [vmem:[#allocation5 + $0x258] sm:$0xff] }
  0x4d   : > { %1384 = vmatpush.bf16.msra.mxu3 %v2295_v31  ;;  %1343 = vmatmul.bf16.vlgmr.msra.gmra.mxu0 %v1675_v44  ;;  %v2365_v31 = vld [vmem:[#allocation5 + $0x2f0] sm:$0xff]  ;;  %v2388_v14 = vld [vmem:[#allocation5 + $0x3a8] sm:$0xff]  ;;  %v2371_v16 = vld [vmem:[#allocation5 + $0x320] sm:$0xff] }
  0x4e   : > { %1391 = vmatpush.bf16.msrb.mxu0 %v2310_v32  ;;  %1357 = vmatmul.bf16.vlgmr.msra.gmra.mxu1 %v1679_v46  ;;  %v2340_v32 = vld [vmem:[#allocation5 + $0x228] sm:$0xff]  ;;  %v2337_v44 = vld [vmem:[#allocation5 + $0x210] sm:$0xff]  ;;  %v2379_v17 = vld [vmem:[#allocation5 + $0x360] sm:$0xff] }
  0x4f   : > { %1405 = vmatpush.bf16.msrb.mxu1 %v2318_v33  ;;  %1371 = vmatmul.bf16.vlgmr.msra.gmra.mxu2 %v1683_v45  ;;  %v2348_v33 = vld [vmem:[#allocation5 + $0x268] sm:$0xff]  ;;  %v2345_v45 = vld [vmem:[#allocation5 + $0x250] sm:$0xff]  ;;  %v2387_v18 = vld [vmem:[#allocation5 + $0x3a0] sm:$0xff] }
  0x50   : > { %1419 = vmatpush.bf16.msrb.mxu2 %v2326_v42  ;;  %1385 = vmatmul.bf16.vlgmr.msra.gmra.mxu3 %v1687_v47  ;;  %v2354_v42 = vld [vmem:[#allocation5 + $0x298] sm:$0xff]  ;;  %v2353_v46 = vld [vmem:[#allocation5 + $0x290] sm:$0xff]  ;;  %v2396_v15 = vld [vmem:[#allocation5 + $0x3e8] sm:$0xff] }
  0x51   : > { %1433 = vmatpush.bf16.msrb.mxu3 %v2334_v43  ;;  %v2362_v43 = vld [vmem:[#allocation5 + $0x2d8] sm:$0xff]  ;;  %v2361_v47 = vld [vmem:[#allocation5 + $0x2d0] sm:$0xff]  ;;  %v2395_v19 = vld [vmem:[#allocation5 + $0x3e0] sm:$0xff] }
  0x52   : > { %1392 = vmatpush.bf16.msrb.mxu0 %v2309_v48  ;;  %v2336_v48 = vld [vmem:[#allocation5 + $0x208] sm:$0xff]  ;;  %v2370_v20 = vld [vmem:[#allocation5 + $0x318] sm:$0xff] }
  0x53   : > { %1406 = vmatpush.bf16.msrb.mxu1 %v2317_v49  ;;  %v2344_v49 = vld [vmem:[#allocation5 + $0x248] sm:$0xff]  ;;  %v2378_v21 = vld [vmem:[#allocation5 + $0x358] sm:$0xff] }
  0x54   : > { %1420 = vmatpush.bf16.msrb.mxu2 %v2325_v50  ;;  %v2352_v50 = vld [vmem:[#allocation5 + $0x288] sm:$0xff] }
  0x55   : > { %1434 = vmatpush.bf16.msrb.mxu3 %v2333_v51  ;;  %v2360_v51 = vld [vmem:[#allocation5 + $0x2c8] sm:$0xff] }
  0x56   : > { %1393 = vmatpush.bf16.msrb.mxu0 %v2308_v52  ;;  %v2335_v52 = vld [vmem:[#allocation5 + $0x200] sm:$0xff] }
  0x57   : > { %1407 = vmatpush.bf16.msrb.mxu1 %v2316_v53  ;;  %v2343_v53 = vld [vmem:[#allocation5 + $0x240] sm:$0xff] }
  0x58   : > { %1421 = vmatpush.bf16.msrb.mxu2 %v2324_v54  ;;  %v2351_v54 = vld [vmem:[#allocation5 + $0x280] sm:$0xff] }
  0x59   : > { %1435 = vmatpush.bf16.msrb.mxu3 %v2332_v55  ;;  %v2359_v55 = vld [vmem:[#allocation5 + $0x2c0] sm:$0xff] }
  0x5a   : > { %1394 = vmatpush.bf16.msrb.mxu0 %v2307_v56  ;;  %v2374_v56 = vld [vmem:[#allocation5 + $0x338] sm:$0xff] }
  0x5b   : > { %1408 = vmatpush.bf16.msrb.mxu1 %v2315_v57  ;;  %v2382_v57 = vld [vmem:[#allocation5 + $0x378] sm:$0xff] }
  0x5c   : > { %1422 = vmatpush.bf16.msrb.mxu2 %v2323_v58  ;;  %v1706_v58 = vld [vmem:[%s2722_s25 + $0x20] sm:$0xf] }
  0x5d   : > { %1436 = vmatpush.bf16.msrb.mxu3 %v2331_v59  ;;  %v2267_v59 = vld [vmem:[%s2722_s25 + $0x5c] sm:$0xf0] }
  0x5e   : > { %1395 = vmatpush.bf16.msrb.mxu0 %v2306_v60  ;;  %v1714_v60 = vld [vmem:[%s2722_s25 + $0x28] sm:$0xf] }
  0x5f   : > { %1409 = vmatpush.bf16.msrb.mxu1 %v2314_v61  ;;  %v2268_v61 = vld [vmem:[%s2722_s25 + $0x64] sm:$0xf0] }
  0x60   : > { %1423 = vmatpush.bf16.msrb.mxu2 %v2322_v62  ;;  %v2259_v62 = vld [vmem:[%s2722_s25 + $0x24] sm:$0xf] }
  0x61   : > { %1437 = vmatpush.bf16.msrb.mxu3 %v2330_v63  ;;  %v1708_v63 = vld [vmem:[%s2722_s25 + $0x60] sm:$0xf0] }
  0x62   : > { %1396 = vmatpush.bf16.msrb.mxu0 %v2305_v0  ;;  %v2260_v0 = vld [vmem:[%s2722_s25 + $0x2c] sm:$0xf] }
  0x63   : > { %1410 = vmatpush.bf16.msrb.mxu1 %v2313_v1  ;;  %v1716_v1 = vld [vmem:[%s2722_s25 + $0x68] sm:$0xf0] }
  0x64   : > { %1424 = vmatpush.bf16.msrb.mxu2 %v2321_v2  ;;  %v2390_v2 = vld [vmem:[#allocation5 + $0x3b8] sm:$0xff] }
  0x65   : > { %1438 = vmatpush.bf16.msrb.mxu3 %v2329_v3  ;;  %v2398_v3 = vld [vmem:[#allocation5 + $0x3f8] sm:$0xff] }
  0x66   : > { %1397 = vmatpush.bf16.msrb.mxu0 %v2304_v4  ;;  %v1707_v4 = vor.u32 %v2267_v59, %v1706_v58 }
  0x67   : > { %1411 = vmatpush.bf16.msrb.mxu1 %v2312_v5  ;;  %v1715_v5 = vor.u32 %v2268_v61, %v1714_v60 }
  0x68   : > { %1425 = vmatpush.bf16.msrb.mxu2 %v2320_v6  ;;  %v1711_v6 = vor.u32 %v2259_v62, %v1708_v63 }
  0x69   : > { %1439 = vmatpush.bf16.msrb.mxu3 %v2328_v7  ;;  %v1719_v7 = vor.u32 %v2260_v0, %v1716_v1 }
  0x6a   : > { %1398 = vmatpush.bf16.msrb.mxu0 %v2303_v8  ;;  %v2373_v8 = vld [vmem:[#allocation5 + $0x330] sm:$0xff] }
  0x6b   : > { %1412 = vmatpush.bf16.msrb.mxu1 %v2311_v9  ;;  %v2381_v9 = vld [vmem:[#allocation5 + $0x370] sm:$0xff] }
  0x6c   : > { %1426 = vmatpush.bf16.msrb.mxu2 %v2319_v10  ;;  %v2389_v10 = vld [vmem:[#allocation5 + $0x3b0] sm:$0xff] }
  0x6d   : > { %1440 = vmatpush.bf16.msrb.mxu3 %v2327_v11  ;;  %1399 = vmatmul.bf16.vlgmr.msrb.gmra.mxu0 %v1691_v24  ;;  %v2397_v11 = vld [vmem:[#allocation5 + $0x3f0] sm:$0xff] }
  0x6e   : > { %1447 = vmatpush.bf16.msra.mxu0 %v2342_v12  ;;  %1413 = vmatmul.bf16.vlgmr.msrb.gmra.mxu1 %v1695_v26  ;;  %v2372_v12 = vld [vmem:[#allocation5 + $0x328] sm:$0xff]  ;;  %v2369_v24 = vld [vmem:[#allocation5 + $0x310] sm:$0xff] }
  0x6f   : > { %1461 = vmatpush.bf16.msra.mxu1 %v2350_v13  ;;  %1427 = vmatmul.bf16.vlgmr.msrb.gmra.mxu2 %v1699_v25  ;;  %v2380_v13 = vld [vmem:[#allocation5 + $0x368] sm:$0xff]  ;;  %v2377_v25 = vld [vmem:[#allocation5 + $0x350] sm:$0xff] }
  0x70   : > { %1475 = vmatpush.bf16.msra.mxu2 %v2358_v22  ;;  %1441 = vmatmul.bf16.vlgmr.msrb.gmra.mxu3 %v1703_v27  ;;  %v2386_v22 = vld [vmem:[#allocation5 + $0x398] sm:$0xff]  ;;  %v2385_v26 = vld [vmem:[#allocation5 + $0x390] sm:$0xff] }
  0x71   : > { %1489 = vmatpush.bf16.msra.mxu3 %v2366_v23  ;;  %v2394_v23 = vld [vmem:[#allocation5 + $0x3d8] sm:$0xff]  ;;  %v2393_v27 = vld [vmem:[#allocation5 + $0x3d0] sm:$0xff] }
  0x72   : > { %1448 = vmatpush.bf16.msra.mxu0 %v2341_v28  ;;  %v2368_v28 = vld [vmem:[#allocation5 + $0x308] sm:$0xff] }
  0x73   : > { %1462 = vmatpush.bf16.msra.mxu1 %v2349_v29  ;;  %v2376_v29 = vld [vmem:[#allocation5 + $0x348] sm:$0xff] }
  0x74   : > { %1476 = vmatpush.bf16.msra.mxu2 %v2357_v30  ;;  %v2384_v30 = vld [vmem:[#allocation5 + $0x388] sm:$0xff] }
  0x75   : > { %1490 = vmatpush.bf16.msra.mxu3 %v2365_v31  ;;  %v2392_v31 = vld [vmem:[#allocation5 + $0x3c8] sm:$0xff] }
  0x76   : > { %1449 = vmatpush.bf16.msra.mxu0 %v2340_v32  ;;  %v2367_v32 = vld [vmem:[#allocation5 + $0x300] sm:$0xff] }
  0x77   : > { %1463 = vmatpush.bf16.msra.mxu1 %v2348_v33  ;;  %v2375_v33 = vld [vmem:[#allocation5 + $0x340] sm:$0xff] }
  0x78   : > { %1477 = vmatpush.bf16.msra.mxu2 %v2356_v34  ;;  %v2383_v34 = vld [vmem:[#allocation5 + $0x380] sm:$0xff] }
  0x79   : > { %1491 = vmatpush.bf16.msra.mxu3 %v2364_v35  ;;  %v2391_v35 = vld [vmem:[#allocation5 + $0x3c0] sm:$0xff] }
  0x7a   : > { %1450 = vmatpush.bf16.msra.mxu0 %v2339_v36  ;;  %v1722_v36 = vld [vmem:[%s2722_s25 + $0x30] sm:$0xf] }
  0x7b   : > { %1464 = vmatpush.bf16.msra.mxu1 %v2347_v37  ;;  %v2269_v37 = vld [vmem:[%s2722_s25 + $0x6c] sm:$0xf0] }
  0x7c   : > { %1478 = vmatpush.bf16.msra.mxu2 %v2355_v38  ;;  %v2261_v38 = vld [vmem:[%s2722_s25 + $0x34] sm:$0xf] }
  0x7d   : > { %1492 = vmatpush.bf16.msra.mxu3 %v2363_v39  ;;  %v1724_v39 = vld [vmem:[%s2722_s25 + $0x70] sm:$0xf0] }
  0x7e   : > { %1451 = vmatpush.bf16.msra.mxu0 %v2338_v40  ;;  %v1730_v40 = vld [vmem:[%s2722_s25 + $0x38] sm:$0xf] }
  0x7f   : > { %1465 = vmatpush.bf16.msra.mxu1 %v2346_v41  ;;  %v2270_v41 = vld [vmem:[%s2722_s25 + $0x74] sm:$0xf0] }
  0x80   : > { %1479 = vmatpush.bf16.msra.mxu2 %v2354_v42  ;;  %v2262_v42 = vld [vmem:[%s2722_s25 + $0x3c] sm:$0xf] }
  0x81   : > { %1493 = vmatpush.bf16.msra.mxu3 %v2362_v43  ;;  %v1732_v43 = vld [vmem:[%s2722_s25 + $0x78] sm:$0xf0] }
  0x82   : > { %1452 = vmatpush.bf16.msra.mxu0 %v2337_v44  ;;  %v1723_v44 = vor.u32 %v2269_v37, %v1722_v36 }
  0x83   : > { %1466 = vmatpush.bf16.msra.mxu1 %v2345_v45  ;;  %v1727_v45 = vor.u32 %v2261_v38, %v1724_v39 }
  0x84   : > { %1480 = vmatpush.bf16.msra.mxu2 %v2353_v46  ;;  %v1731_v46 = vor.u32 %v2270_v41, %v1730_v40 }
  0x85   : > { %1494 = vmatpush.bf16.msra.mxu3 %v2361_v47  ;;  %v1735_v47 = vor.u32 %v2262_v42, %v1732_v43 }
  0x86   : > { %1453 = vmatpush.bf16.msra.mxu0 %v2336_v48 }
  0x87   : > { %1467 = vmatpush.bf16.msra.mxu1 %v2344_v49 }
  0x88   : > { %1481 = vmatpush.bf16.msra.mxu2 %v2352_v50 }
  0x89   : > { %1495 = vmatpush.bf16.msra.mxu3 %v2360_v51 }
  0x8a   : > { %1454 = vmatpush.bf16.msra.mxu0 %v2335_v52 }
  0x8b   : > { %1468 = vmatpush.bf16.msra.mxu1 %v2343_v53  ;;  %v2462_v53 = vld [vmem:[%s2802_s2] ss:$0 sm:$0xff] }
  0x8c   : > { %1482 = vmatpush.bf16.msra.mxu2 %v2351_v54 }
  0x8d   : > { %1496 = vmatpush.bf16.msra.mxu3 %v2359_v55  ;;  %1455 = vmatmul.bf16.vlgmr.msra.gmra.mxu0 %v1707_v4 }
  0x8e   : > { %1503 = vmatpush.bf16.msrb.mxu0 %v2374_v56  ;;  %1469 = vmatmul.bf16.vlgmr.msra.gmra.mxu1 %v1711_v6 }
  0x8f   : > { %1517 = vmatpush.bf16.msrb.mxu1 %v2382_v57  ;;  %1483 = vmatmul.bf16.vlgmr.msra.gmra.mxu2 %v1715_v5 }
  0x90   : > { %1531 = vmatpush.bf16.msrb.mxu2 %v2390_v2  ;;  %1497 = vmatmul.bf16.vlgmr.msra.gmra.mxu3 %v1719_v7 }
  0x91   : > { %1545 = vmatpush.bf16.msrb.mxu3 %v2398_v3 }
  0x92   : > { %1504 = vmatpush.bf16.msrb.mxu0 %v2373_v8 }
  0x93   : > { %1518 = vmatpush.bf16.msrb.mxu1 %v2381_v9 }
  0x94   : > { %1532 = vmatpush.bf16.msrb.mxu2 %v2389_v10 }
  0x95   : > { %1546 = vmatpush.bf16.msrb.mxu3 %v2397_v11 }
  0x96   : > { %1505 = vmatpush.bf16.msrb.mxu0 %v2372_v12 }
  0x97   : > { %1519 = vmatpush.bf16.msrb.mxu1 %v2380_v13 }
  0x98   : > { %1533 = vmatpush.bf16.msrb.mxu2 %v2388_v14 }
  0x99   : > { %1547 = vmatpush.bf16.msrb.mxu3 %v2396_v15 }
  0x9a   : > { %1506 = vmatpush.bf16.msrb.mxu0 %v2371_v16 }
  0x9b   : > { %1520 = vmatpush.bf16.msrb.mxu1 %v2379_v17 }
  0x9c   : > { %1534 = vmatpush.bf16.msrb.mxu2 %v2387_v18 }
  0x9d   : > { %1548 = vmatpush.bf16.msrb.mxu3 %v2395_v19 }
  0x9e   : > { %1507 = vmatpush.bf16.msrb.mxu0 %v2370_v20 }
  0x9f   : > { %1521 = vmatpush.bf16.msrb.mxu1 %v2378_v21 }
  0xa0   : > { %1535 = vmatpush.bf16.msrb.mxu2 %v2386_v22 }
  0xa1   : > { %1549 = vmatpush.bf16.msrb.mxu3 %v2394_v23 }
  0xa2   : > { %1508 = vmatpush.bf16.msrb.mxu0 %v2369_v24 }
  0xa3   : > { %1522 = vmatpush.bf16.msrb.mxu1 %v2377_v25 }
  0xa4   : > { %1536 = vmatpush.bf16.msrb.mxu2 %v2385_v26 }
  0xa5   : > { %1550 = vmatpush.bf16.msrb.mxu3 %v2393_v27 }
  0xa6   : > { %1509 = vmatpush.bf16.msrb.mxu0 %v2368_v28 }
  0xa7   : > { %1523 = vmatpush.bf16.msrb.mxu1 %v2376_v29 }
  0xa8   : > { %1537 = vmatpush.bf16.msrb.mxu2 %v2384_v30 }
  0xa9   : > { %1551 = vmatpush.bf16.msrb.mxu3 %v2392_v31 }
  0xaa   : > { %1510 = vmatpush.bf16.msrb.mxu0 %v2367_v32 }
  0xab   : > { %1524 = vmatpush.bf16.msrb.mxu1 %v2375_v33 }
  0xac   : > { %1538 = vmatpush.bf16.msrb.mxu2 %v2383_v34 }
  0xad   : > { %1552 = vmatpush.bf16.msrb.mxu3 %v2391_v35  ;;  %1511 = vmatmul.bf16.vlgmr.msrb.gmra.mxu0 %v1723_v44 }
  0xae   : > { %1525 = vmatmul.bf16.vlgmr.msrb.gmra.mxu1 %v1727_v45 }
  0xaf   : > { %1539 = vmatmul.bf16.vlgmr.msrb.gmra.mxu2 %v1731_v46 }
  0xb0   : > { %1553 = vmatmul.bf16.vlgmr.msrb.gmra.mxu3 %v1735_v47 }
  0xca   : > { %v1344_v48 = vpop.f32.mrf.mxu0 }
  0xcb   : > { %v1358_v49 = vpop.f32.mrf.mxu1  ;;  %v1345_v55 = vadd.f32 %v2462_v53, %v1344_v48 }
  0xcd   : > { %v1359_v58 = vadd.f32 %v1358_v49, %v1345_v55 }
  0xd2   : > { %v1372_v50 = vpop.f32.mrf.mxu2  ;;  %v1346_v52 = vpop.f32.mrf.mxu0 }
  0xd3   : > { %v1386_v51 = vpop.f32.mrf.mxu3  ;;  %v1360_v54 = vpop.f32.mrf.mxu1  ;;  %v1373_v61 = vadd.f32 %v1372_v50, %v1359_v58  ;;  %v1347_v62 = vadd.f32 %v2462_v53, %v1346_v52 }
  0xd5   : > { %v1387_v1 = vadd.f32 %v1386_v51, %v1373_v61  ;;  %v1361_v2 = vadd.f32 %v1360_v54, %v1347_v62 }
  0xda   : > { %v1374_v56 = vpop.f32.mrf.mxu2 }
  0xdb   : > { %v1388_v57 = vpop.f32.mrf.mxu3  ;;  %v1375_v6 = vadd.f32 %v1374_v56, %v1361_v2 }
  0xdd   : > { %v1389_v10 = vadd.f32 %v1388_v57, %v1375_v6 }
  0xea   : > { %v1400_v59 = vpop.f32.mrf.mxu0 }
  0xeb   : > { %v1414_v60 = vpop.f32.mrf.mxu1  ;;  %v1401_v4 = vadd.f32 %v1400_v59, %v1387_v1 }
  0xed   : > { %v1415_v7 = vadd.f32 %v1414_v60, %v1401_v4 }
  0xf2   : > { %v1428_v63 = vpop.f32.mrf.mxu2  ;;  %v1402_v3 = vpop.f32.mrf.mxu0 }
  0xf3   : > { %v1442_v0 = vpop.f32.mrf.mxu3  ;;  %v1416_v5 = vpop.f32.mrf.mxu1  ;;  %v1429_v12 = vadd.f32 %v1428_v63, %v1415_v7  ;;  %v1403_v14 = vadd.f32 %v1402_v3, %v1389_v10 }
  0xf5   : > { %v1443_v15 = vadd.f32 %v1442_v0, %v1429_v12  ;;  %v1417_v18 = vadd.f32 %v1416_v5, %v1403_v14 }
  0xfa   : > { %v1430_v8 = vpop.f32.mrf.mxu2 }
  0xfb   : > { %v1444_v9 = vpop.f32.mrf.mxu3  ;;  %v1431_v20 = vadd.f32 %v1430_v8, %v1417_v18 }
  0xfd   : > { %v1445_v24 = vadd.f32 %v1444_v9, %v1431_v20 }
 0x10a   : > { %v1456_v11 = vpop.f32.mrf.mxu0 }
 0x10b   : > { %v1470_v13 = vpop.f32.mrf.mxu1  ;;  %v1457_v19 = vadd.f32 %v1456_v11, %v1443_v15 }
 0x10d   : > { %v1471_v22 = vadd.f32 %v1470_v13, %v1457_v19 }
 0x112   : > { %v1484_v16 = vpop.f32.mrf.mxu2  ;;  %v1458_v21 = vpop.f32.mrf.mxu0 }
 0x113   : > { %v1498_v17 = vpop.f32.mrf.mxu3  ;;  %v1472_v23 = vpop.f32.mrf.mxu1  ;;  %v1485_v25 = vadd.f32 %v1484_v16, %v1471_v22  ;;  %v1459_v26 = vadd.f32 %v1458_v21, %v1445_v24 }
 0x115   : > { %v1499_v29 = vadd.f32 %v1498_v17, %v1485_v25  ;;  %v1473_v31 = vadd.f32 %v1472_v23, %v1459_v26 }
 0x11a   : > { %v1486_v27 = vpop.f32.mrf.mxu2 }
 0x11b   : > { %v1500_v28 = vpop.f32.mrf.mxu3  ;;  %v1487_v34 = vadd.f32 %v1486_v27, %v1473_v31 }
 0x11d   : > { %v1501_v38 = vadd.f32 %v1500_v28, %v1487_v34 }
 0x12a   : > { %v1512_v30 = vpop.f32.mrf.mxu0 }
 0x12b   : > { %v1513_v32 = vadd.f32 %v1512_v30, %v1499_v29  ;;  %v1526_v33 = vpop.f32.mrf.mxu1 }
 0x12d   : > { %v1527_v35 = vadd.f32 %v1526_v33, %v1513_v32 }
 0x132   : > { %v1540_v36 = vpop.f32.mrf.mxu2  ;;  %v1514_v40 = vpop.f32.mrf.mxu0 }
 0x133   : > { %v1554_v37 = vpop.f32.mrf.mxu3  ;;  %v1541_v39 = vadd.f32 %v1540_v36, %v1527_v35  ;;  %v1515_v42 = vadd.f32 %v1514_v40, %v1501_v38  ;;  %v1528_v43 = vpop.f32.mrf.mxu1 }
 0x135   : > { %v1555_v41 = vadd.f32 %v1554_v37, %v1541_v39  ;;  %v1529_v44 = vadd.f32 %v1528_v43, %v1515_v42 }
 0x137   : > { %1559 = vst [vmem:[%s208_s28] sm:$0xff] %v1555_v41 }
 0x13a   : > { %v1542_v45 = vpop.f32.mrf.mxu2 }
 0x13b   : > { %v1543_v46 = vadd.f32 %v1542_v45, %v1529_v44  ;;  %v1556_v47 = vpop.f32.mrf.mxu3 }
 0x13d   : > { %v1557_v48 = vadd.f32 %v1556_v47, %v1543_v46 }
 0x13f   : > { %1560 = vst [vmem:[%s208_s28 + $0x8] sm:$0xff] %v1557_v48 }
 0x140   : > { %2550 = shalt.err (!%p2547_p10)
}
 0x141   : > { %s2599_s10 = smov 128   ;;  %s2600_s18 = smov 8  }
 0x142   : > { %2406 = dma.vmem_to_hbm [thread:$0]  (%p2689_p5), %s1575_s29, 256, %s1577_s30, %s1562_s16, %s2599_s10, %s2599_s10, %s2600_s18  }
 0x143 PF: > { %p2423_p11 = scmp.ge.s32.totalorder %s2593_s15, 2  ;;  %s1591_s23 = sand.u32 1, %s2581_s12  }
 0x144   : > { %s1592_s27 = scalar_lea.sflag [#allocation4], %s1591_s23 }
 0x145   : > { %p2417_p12 = pnand %p2423_p11, %p2656_p6 }
 0x147   : > { %p2418_p13 = pneg %p2417_p12 }
 0x149   : > { %2576 = dma.done.wait (%p2418_p13), %s1592_s27, 256  }
 0x14a   : > { %2578 = vsyncadd (%p2418_p13), %s1592_s27, 4294967040  ;;  %p17_p0 = scmp.ge.s32.totalorder %s2673_s26, 5   ;;  %s2809_s12 = smov %s2585_s13 }
 0x14b   : > { %s2810_s13 = smov %s2589_s14  ;;  %s2811_s14 = smov %s2685_s4 }
 0x14c   : > { %s2812_s15 = smov %s2673_s26  ;;  %19 = sbr.rel (!%p17_p0) target bundleno = 6 (0x6), region = 81 }
 0x151   :  { %1598 = vsyncpa [#allocation3], 1 }
 0x152   :  { %1600 = vsyncpa [#allocation3 + $0x1], 1 }
 0x153   :  { %1601 = vsyncpa [#allocation6], 1 }
 0x154   :  { %1602 = vsyncpa [#allocation4], 1 }
 0x155   :  { %1604 = vsyncpa [#allocation4 + $0x1], 1 }

</bundles_post_ra>
